<compile_context>
chip_gen: v7x
topology: tpu7x:2x2x1
jax: 0.10.0
libtpu: 0.0.40
codegen_flags: <defaults>
</compile_context>

<pallas_src>
import functools

import jax
import jax.numpy as jnp
import numpy as np
from jax.experimental import pallas as pl
from jax.experimental.pallas import tpu as pltpu


def _time_attention_kernel(x_ref, y_ref, wkq_ref, wv_ref, o_ref, *, cout, chunk):
    # x_ref, y_ref, o_ref: (Cin, N)     (batch dim squeezed away)
    # wkq_ref: (2*Cout, Cin+1)          rows = [Wk|bk ; Wq|bq]
    # wv_ref:  (Cin+1, Cin+1)           rows = [wl@wv | wl@bv+bl ; 0..0 | 1]
    cin = wv_ref.shape[0] - 1
    n = x_ref.shape[-1]

    x = x_ref[...]                       # (Cin, N)
    y = y_ref[...]                       # (Cin, N)
    wkq = wkq_ref[...]                   # (2*Cout, Cin+1)
    wv = wv_ref[...]                     # (Cin+1, Cin+1)

    # Fused K|Q projection (one MXU matmul); bias column broadcast-added.
    kq = jnp.dot(wkq[:, :cin], x,
                 preferred_element_type=jnp.float32) + wkq[:, cin:]          # (2*Cout, N)
    k = kq[:cout]                        # (Cout, N)
    q = kq[cout:]                        # (Cout, N)

    # V projection with local_weight + all biases pre-folded in the wrapper.
    # Last row of wv is [0..0, 1] so v_aug's last row is all ones and the
    # V@P matmul below emits the softmax denominator as its last output row.
    v_aug = jnp.dot(wv[:, :cin], y,
                    preferred_element_type=jnp.float32) + wv[:, cin:]        # (Cin+1, N)

    # Attention over 128-lane chunks of the output spatial index i.
    # S[j, i] = sum_c Q[c, j] * K[c, i]  ==  (torch KQ)^T, so the torch
    # softmax over dim=-1 of KQ is a softmax over the sublane axis of S,
    # making max / denom lane-dense (1, chunk) rows.
    n_chunks = n // chunk
    for c in range(n_chunks):
        sl = slice(c * chunk, (c + 1) * chunk)
        k_c = k[:, sl]                                                        # (Cout, chunk)
        s_c = jax.lax.dot_general(q, k_c, (((0,), (0,)), ((), ())),
                                  preferred_element_type=jnp.float32)        # (N, chunk)
        m_c = jnp.max(s_c, axis=0, keepdims=True)                            # (1, chunk)
        p_c = jnp.exp(s_c - m_c)                                             # (N, chunk)

        # Un-normalized (local_weight-projected) output + denominator row.
        vec_c = jnp.dot(v_aug, p_c, preferred_element_type=jnp.float32)      # (Cin+1, chunk)
        denom = vec_c[cin:]                                                  # (1, chunk)
        inv = 1.0 / denom            # exact divide (approx recip failed 1e-3 tol)

        o_ref[:, sl] = (y[:, sl] + vec_c[:cin] * inv).astype(o_ref.dtype)


def pack_params(params):
    """Pack/fold module parameters once (hoisted out of the per-call path)."""
    cout, cin = params["wk"].shape

    # [Wk | bk ; Wq | bq]  -> (2*Cout, Cin+1)
    wkq = jnp.concatenate([
        jnp.concatenate([params["wk"], params["bk"][:, None]], axis=1),
        jnp.concatenate([params["wq"], params["bq"][:, None]], axis=1),
    ], axis=0).astype(jnp.float32)

    # Fold local_weight into V:  Wv' = wl @ wv,  bv' = wl @ bv + bl.
    wv_fold = params["wl"] @ params["wv"]                                    # (Cin, Cin)
    bv_fold = params["wl"] @ params["bv"] + params["bl"]                     # (Cin,)
    top = jnp.concatenate([wv_fold, bv_fold[:, None]], axis=1)               # (Cin, Cin+1)
    bot = jnp.concatenate([jnp.zeros((1, cin), jnp.float32),
                           jnp.ones((1, 1), jnp.float32)], axis=1)           # (1, Cin+1)
    wv = jnp.concatenate([top, bot], axis=0).astype(jnp.float32)             # (Cin+1, Cin+1)

    return {"wkq": wkq, "wv": wv, "cout": cout, "cin": cin}


def time_attention(x, y, packed):
    """x, y: (B, Cin, H, W) NCHW float32. Returns (B, Cin, H, W)."""
    B, Cin, H, Wd = x.shape
    N = H * Wd
    Cout = packed["cout"]
    chunk = 128 if (N % 128 == 0 and N > 128) else N

    # Natural NCHW flatten (pure reshape, no transpose): (B, Cin, N).
    x_f = x.reshape(B, Cin, N)
    y_f = y.reshape(B, Cin, N)

    kernel = functools.partial(_time_attention_kernel, cout=Cout, chunk=chunk)

    out = pl.pallas_call(
        kernel,
        out_shape=jax.ShapeDtypeStruct((B, Cin, N), jnp.float32),
        grid_spec=pltpu.PrefetchScalarGridSpec(
            num_scalar_prefetch=0,
            grid=(B,),
            in_specs=[
                pl.BlockSpec((pl.Squeezed(), Cin, N), lambda b: (b, 0, 0)),   # x
                pl.BlockSpec((pl.Squeezed(), Cin, N), lambda b: (b, 0, 0)),   # y
                pl.BlockSpec((2 * Cout, Cin + 1), lambda b: (0, 0)),          # Wk|bk ; Wq|bq
                pl.BlockSpec((Cin + 1, Cin + 1), lambda b: (0, 0)),           # folded V slab
            ],
            out_specs=pl.BlockSpec((pl.Squeezed(), Cin, N), lambda b: (b, 0, 0)),
        ),
        compiler_params=pltpu.CompilerParams(
            dimension_semantics=("parallel",)),
        # Residual add writes over y's (fresh, wrapper-local) buffer.
        input_output_aliases={1: 0},
    )(x_f, y_f, packed["wkq"], packed["wv"])

    return out.reshape(B, Cin, H, Wd)


def reference(x, y, p):
    """Pure-JAX reference of the PyTorch forward (kernel_size=1, stride=1)."""
    B, Cin, H, Wd = x.shape
    N = H * Wd
    xf = x.reshape(B, Cin, N)
    yf = y.reshape(B, Cin, N)
    K = jnp.einsum("oc,bcn->bon", p["wk"], xf) + p["bk"][None, :, None]
    Q = jnp.einsum("oc,bcn->bon", p["wq"], xf) + p["bq"][None, :, None]
    V = jnp.einsum("oc,bcn->bon", p["wv"], yf) + p["bv"][None, :, None]
    KQ = jnp.einsum("bci,bcj->bij", K, Q)           # (B, N, N), matches K^T Q
    attn = jax.nn.softmax(KQ, axis=-1)
    vec = jnp.einsum("bij,bcj->bci", attn, V)       # (B, Cout, N) channel-major
    W = jnp.einsum("oc,bcn->bon", p["wl"], vec) + p["bl"][None, :, None]
    out = yf + W
    return out.reshape(B, Cin, H, Wd)


if __name__ == "__main__":
    # Module config: input_size=4, output_size=8, kernel_size=1, stride=1,
    # padding=0, scale=2  (pool branch unused when stride == 1).
    B, Cin, Cout, H, Wd = 2, 4, 8, 16, 16

    key = jax.random.PRNGKey(0)
    ks = jax.random.split(key, 10)

    s_in = 1.0 / np.sqrt(Cin)
    s_out = 1.0 / np.sqrt(Cout)
    params = {
        "wk": jax.random.uniform(ks[0], (Cout, Cin), jnp.float32, -s_in, s_in),
        "bk": jax.random.uniform(ks[1], (Cout,), jnp.float32, -s_in, s_in),
        "wq": jax.random.uniform(ks[2], (Cout, Cin), jnp.float32, -s_in, s_in),
        "bq": jax.random.uniform(ks[3], (Cout,), jnp.float32, -s_in, s_in),
        "wv": jax.random.uniform(ks[4], (Cout, Cin), jnp.float32, -s_in, s_in),
        "bv": jax.random.uniform(ks[5], (Cout,), jnp.float32, -s_in, s_in),
        "wl": jax.random.uniform(ks[6], (Cin, Cout), jnp.float32, -s_out, s_out),
        "bl": jax.random.uniform(ks[7], (Cin,), jnp.float32, -s_out, s_out),
    }

    x = jax.random.normal(ks[8], (B, Cin, H, Wd), jnp.float32)
    y = jax.random.normal(ks[9], (B, Cin, H, Wd), jnp.float32)

    packed = jax.tree_util.tree_map(jax.block_until_ready,
                                    pack_params(params))   # hoisted, done once

    ref = jax.block_until_ready(reference(x, y, params))
    out = jax.block_until_ready(time_attention(x, y, packed))

    np.testing.assert_allclose(np.asarray(out), np.asarray(ref),
                               rtol=1e-3, atol=1e-3)
    print("KERNEL_OK")
</pallas_src>

<mosaic_0001>
module attributes {stable_mosaic.version = 11 : i64} {
  func.func @_time_attention_kernel(%arg0: i32, %arg1: memref<1x4x256xf32, #tpu.memory_space<vmem>>, %arg2: memref<1x4x256xf32, #tpu.memory_space<vmem>>, %arg3: memref<16x5xf32, #tpu.memory_space<vmem>>, %arg4: memref<5x5xf32, #tpu.memory_space<vmem>>, %arg5: memref<1x4x256xf32, #tpu.memory_space<vmem>>) attributes {dimension_semantics = [#tpu.dimension_semantics<parallel>], iteration_bounds = array<i64: 2>, scalar_prefetch = 0 : i64, scratch_operands = 0 : i64, tpu.core_type = #tpu.core_type<tc>, window_params = [{transform_indices = @transform_0, window_bounds = array<i64: 1, 4, 256>}, {transform_indices = @transform_1, window_bounds = array<i64: 1, 4, 256>}, {pipeline_mode = #tpu.pipeline_mode<synchronous>, transform_indices = @transform_2, window_bounds = array<i64: 16, 5>}, {pipeline_mode = #tpu.pipeline_mode<synchronous>, transform_indices = @transform_3, window_bounds = array<i64: 5, 5>}, {transform_indices = @transform_4, window_bounds = array<i64: 1, 4, 256>}]} {
    %c0 = arith.constant 0 : index
    %c0_0 = arith.constant 0 : index
    %c0_1 = arith.constant 0 : index
    %0 = vector.load %arg1[%c0, %c0_0, %c0_1] : memref<1x4x256xf32, #tpu.memory_space<vmem>>, vector<1x4x256xf32>
    %1 = vector.shape_cast %0 : vector<1x4x256xf32> to vector<4x256xf32>
    %c0_2 = arith.constant 0 : index
    %c0_3 = arith.constant 0 : index
    %c0_4 = arith.constant 0 : index
    %2 = vector.load %arg2[%c0_2, %c0_3, %c0_4] : memref<1x4x256xf32, #tpu.memory_space<vmem>>, vector<1x4x256xf32>
    %3 = vector.shape_cast %2 : vector<1x4x256xf32> to vector<4x256xf32>
    %c0_5 = arith.constant 0 : index
    %c0_6 = arith.constant 0 : index
    %4 = vector.load %arg3[%c0_5, %c0_6] : memref<16x5xf32, #tpu.memory_space<vmem>>, vector<16x5xf32>
    %c0_7 = arith.constant 0 : index
    %c0_8 = arith.constant 0 : index
    %5 = vector.load %arg4[%c0_7, %c0_8] : memref<5x5xf32, #tpu.memory_space<vmem>>, vector<5x5xf32>
    %6 = vector.extract_strided_slice %4 {offsets = [0, 0], sizes = [16, 4], strides = [1, 1]} : vector<16x5xf32> to vector<16x4xf32>
    %cst = arith.constant dense<0.000000e+00> : vector<16x256xf32>
    %7 = tpu.matmul %6, %1, %cst {dimension_numbers = #tpu.dot_dimension_numbers<[1], [0], [0], [1], [0, 0, 1, 1], [], []>} : vector<16x4xf32>, vector<4x256xf32>, vector<16x256xf32> -> vector<16x256xf32>
    %8 = vector.extract_strided_slice %4 {offsets = [0, 4], sizes = [16, 1], strides = [1, 1]} : vector<16x5xf32> to vector<16x1xf32>
    %9 = vector.broadcast %8 : vector<16x1xf32> to vector<16x256xf32>
    %10 = arith.addf %7, %9 : vector<16x256xf32>
    %11 = vector.extract_strided_slice %10 {offsets = [0, 0], sizes = [8, 256], strides = [1, 1]} : vector<16x256xf32> to vector<8x256xf32>
    %12 = vector.extract_strided_slice %10 {offsets = [8, 0], sizes = [8, 256], strides = [1, 1]} : vector<16x256xf32> to vector<8x256xf32>
    %13 = vector.extract_strided_slice %5 {offsets = [0, 0], sizes = [5, 4], strides = [1, 1]} : vector<5x5xf32> to vector<5x4xf32>
    %cst_9 = arith.constant dense<0.000000e+00> : vector<5x256xf32>
    %14 = tpu.matmul %13, %3, %cst_9 {dimension_numbers = #tpu.dot_dimension_numbers<[1], [0], [0], [1], [0, 0, 1, 1], [], []>} : vector<5x4xf32>, vector<4x256xf32>, vector<5x256xf32> -> vector<5x256xf32>
    %15 = vector.extract_strided_slice %5 {offsets = [0, 4], sizes = [5, 1], strides = [1, 1]} : vector<5x5xf32> to vector<5x1xf32>
    %16 = vector.broadcast %15 : vector<5x1xf32> to vector<5x256xf32>
    %17 = arith.addf %14, %16 : vector<5x256xf32>
    %18 = vector.extract_strided_slice %11 {offsets = [0, 0], sizes = [8, 128], strides = [1, 1]} : vector<8x256xf32> to vector<8x128xf32>
    %cst_10 = arith.constant dense<0.000000e+00> : vector<256x128xf32>
    %19 = tpu.matmul %12, %18, %cst_10 {dimension_numbers = #tpu.dot_dimension_numbers<[0], [0], [1], [1], [0, 1, 1, 1], [], []>} : vector<8x256xf32>, vector<8x128xf32>, vector<256x128xf32> -> vector<256x128xf32>
    %cst_11 = arith.constant dense<0xFF800000> : vector<128xf32>
    %20 = vector.multi_reduction <maximumf>, %19, %cst_11 [0] : vector<256x128xf32> to vector<128xf32>
    %21 = vector.shape_cast %20 : vector<128xf32> to vector<1x128xf32>
    %22 = vector.broadcast %21 : vector<1x128xf32> to vector<256x128xf32>
    %23 = arith.subf %19, %22 : vector<256x128xf32>
    %24 = math.exp %23 : vector<256x128xf32>
    %cst_12 = arith.constant dense<0.000000e+00> : vector<5x128xf32>
    %25 = tpu.matmul %17, %24, %cst_12 {dimension_numbers = #tpu.dot_dimension_numbers<[1], [0], [0], [1], [0, 0, 1, 1], [], []>} : vector<5x256xf32>, vector<256x128xf32>, vector<5x128xf32> -> vector<5x128xf32>
    %26 = vector.extract_strided_slice %25 {offsets = [4, 0], sizes = [1, 128], strides = [1, 1]} : vector<5x128xf32> to vector<1x128xf32>
    %cst_13 = arith.constant 1.000000e+00 : f32
    %27 = vector.broadcast %cst_13 : f32 to vector<1x128xf32>
    %28 = arith.divf %27, %26 : vector<1x128xf32>
    %29 = vector.extract_strided_slice %3 {offsets = [0, 0], sizes = [4, 128], strides = [1, 1]} : vector<4x256xf32> to vector<4x128xf32>
    %30 = vector.extract_strided_slice %25 {offsets = [0, 0], sizes = [4, 128], strides = [1, 1]} : vector<5x128xf32> to vector<4x128xf32>
    %31 = vector.broadcast %28 : vector<1x128xf32> to vector<4x128xf32>
    %32 = arith.mulf %30, %31 : vector<4x128xf32>
    %33 = arith.addf %29, %32 : vector<4x128xf32>
    %c0_14 = arith.constant 0 : index
    %c0_15 = arith.constant 0 : index
    %c0_16 = arith.constant 0 : index
    %34 = vector.load %arg5[%c0_14, %c0_15, %c0_16] : memref<1x4x256xf32, #tpu.memory_space<vmem>>, vector<1x4x128xf32>
    %35 = vector.shape_cast %34 : vector<1x4x128xf32> to vector<4x128xf32>
    %36 = vector.shape_cast %33 : vector<4x128xf32> to vector<1x4x128xf32>
    tpu.vector_store %arg5[%c0_14, %c0_15, %c0_16], %36 {strides = array<i32>} : memref<1x4x256xf32, #tpu.memory_space<vmem>>, vector<1x4x128xf32>,
    %37 = vector.extract_strided_slice %11 {offsets = [0, 128], sizes = [8, 128], strides = [1, 1]} : vector<8x256xf32> to vector<8x128xf32>
    %cst_17 = arith.constant dense<0.000000e+00> : vector<256x128xf32>
    %38 = tpu.matmul %12, %37, %cst_17 {dimension_numbers = #tpu.dot_dimension_numbers<[0], [0], [1], [1], [0, 1, 1, 1], [], []>} : vector<8x256xf32>, vector<8x128xf32>, vector<256x128xf32> -> vector<256x128xf32>
    %cst_18 = arith.constant dense<0xFF800000> : vector<128xf32>
    %39 = vector.multi_reduction <maximumf>, %38, %cst_18 [0] : vector<256x128xf32> to vector<128xf32>
    %40 = vector.shape_cast %39 : vector<128xf32> to vector<1x128xf32>
    %41 = vector.broadcast %40 : vector<1x128xf32> to vector<256x128xf32>
    %42 = arith.subf %38, %41 : vector<256x128xf32>
    %43 = math.exp %42 : vector<256x128xf32>
    %cst_19 = arith.constant dense<0.000000e+00> : vector<5x128xf32>
    %44 = tpu.matmul %17, %43, %cst_19 {dimension_numbers = #tpu.dot_dimension_numbers<[1], [0], [0], [1], [0, 0, 1, 1], [], []>} : vector<5x256xf32>, vector<256x128xf32>, vector<5x128xf32> -> vector<5x128xf32>
    %45 = vector.extract_strided_slice %44 {offsets = [4, 0], sizes = [1, 128], strides = [1, 1]} : vector<5x128xf32> to vector<1x128xf32>
    %cst_20 = arith.constant 1.000000e+00 : f32
    %46 = vector.broadcast %cst_20 : f32 to vector<1x128xf32>
    %47 = arith.divf %46, %45 : vector<1x128xf32>
    %48 = vector.extract_strided_slice %3 {offsets = [0, 128], sizes = [4, 128], strides = [1, 1]} : vector<4x256xf32> to vector<4x128xf32>
    %49 = vector.extract_strided_slice %44 {offsets = [0, 0], sizes = [4, 128], strides = [1, 1]} : vector<5x128xf32> to vector<4x128xf32>
    %50 = vector.broadcast %47 : vector<1x128xf32> to vector<4x128xf32>
    %51 = arith.mulf %49, %50 : vector<4x128xf32>
    %52 = arith.addf %48, %51 : vector<4x128xf32>
    %c0_21 = arith.constant 0 : index
    %c0_22 = arith.constant 0 : index
    %c128 = arith.constant 128 : index
    %53 = vector.load %arg5[%c0_21, %c0_22, %c128] : memref<1x4x256xf32, #tpu.memory_space<vmem>>, vector<1x4x128xf32>
    %54 = vector.shape_cast %53 : vector<1x4x128xf32> to vector<4x128xf32>
    %55 = vector.shape_cast %52 : vector<4x128xf32> to vector<1x4x128xf32>
    tpu.vector_store %arg5[%c0_21, %c0_22, %c128], %55 {strides = array<i32>} : memref<1x4x256xf32, #tpu.memory_space<vmem>>, vector<1x4x128xf32>,
    return
  }
  func.func @transform_0(%arg0: i32) -> (i32, i32, i32) {
    %c0_i32 = arith.constant 0 : i32
    %c0_i32_0 = arith.constant 0 : i32
    %c0_i32_1 = arith.constant 0 : i32
    return %arg0, %c0_i32, %c0_i32_0 : i32, i32, i32
  }
  func.func @transform_1(%arg0: i32) -> (i32, i32, i32) {
    %c0_i32 = arith.constant 0 : i32
    %c0_i32_0 = arith.constant 0 : i32
    %c0_i32_1 = arith.constant 0 : i32
    return %arg0, %c0_i32, %c0_i32_0 : i32, i32, i32
  }
  func.func @transform_2(%arg0: i32) -> (i32, i32) {
    %c0_i32 = arith.constant 0 : i32
    %c0_i32_0 = arith.constant 0 : i32
    %c0_i32_1 = arith.constant 0 : i32
    return %c0_i32, %c0_i32_0 : i32, i32
  }
  func.func @transform_3(%arg0: i32) -> (i32, i32) {
    %c0_i32 = arith.constant 0 : i32
    %c0_i32_0 = arith.constant 0 : i32
    %c0_i32_1 = arith.constant 0 : i32
    return %c0_i32, %c0_i32_0 : i32, i32
  }
  func.func @transform_4(%arg0: i32) -> (i32, i32, i32) {
    %c0_i32 = arith.constant 0 : i32
    %c0_i32_0 = arith.constant 0 : i32
    %c0_i32_1 = arith.constant 0 : i32
    return %arg0, %c0_i32, %c0_i32_0 : i32, i32, i32
  }
}

</mosaic_0001>

<bundles_post_ra>
// kernel: tpu_custom_call.1
= control target key start
LH: loop header
LB: loop body
LE: loop exit
PB: predicated region body
PF: predicated region fallthrough
CT: control target
= control target key end

     0   :  { %9 = vsyncpa [#allocation3], 0  ;;  %s3107_s0 = inlined_call_operand.vmem [shape: f32[2,4,256], index: 0, kind: input, shape index: {}]   ;;  %s3108_s1 = inlined_call_operand.hbm [shape: f32[2,4,256], index: 1, kind: input, shape index: {}, may-alias: {1,4}]   ;;  %s3109_s2 = inlined_call_operand.vmem [shape: f32[16,5], index: 2, kind: input, shape index: {}]   ;;  %s3110_s3 = inlined_call_operand.vmem [shape: f32[5,5], index: 3, kind: input, shape index: {}]   ;;  %s3111_s4 = inlined_call_operand.hbm [shape: f32[2,4,256], index: 4, kind: output, shape index: {}, may-alias: {1,4}]  }
   0x1   :  { %11 = vsyncpa [#allocation3 + $0x1], 0 }
   0x2   :  { %12 = vsyncpa [#allocation4], 0 }
   0x3   :  { %14 = vsyncpa [#allocation4 + $0x1], 0  ;;  %s2257_s15 = smov 0   ;;  %s2259_s16 = smov 0  }
   0x4   :  { %s2261_s17 = smov 0   ;;  %s2263_s18 = smov 0  }
   0x5 LB: > { %s2278_s19 = sadd.s32 4294967295, %s2226_s18   ;;  %s1556_s20 = sadd.s32 4294967294, %s2226_s18   ;;  %s2226_s18 = sphi %s2263_s18, %s3193_s18   ;;  %s2222_s17 = sphi %s2261_s17, %s3192_s17   ;;  %s2218_s16 = sphi %s2259_s16, %s3191_s16   ;;  %s2214_s15 = sphi %s2257_s15, %s3190_s15  }
   0x6   : > { %s2282_s21 = sadd.s32 1, %s2226_s18   ;;  %s53_s22 = sadd.s32 1, %s2222_s17 }
   0x7   : > { %s50_s23 = ssub.s32 %s2226_s18, %s2282_s21  ;;  %p60_p0 = scmp.ne.s32.totalorder %s2222_s17, %s2218_s16 }
   0x8   : > { %p51_p1 = scmp.eq.s32.totalorder %s50_s23, 0  ;;  %p61_p2 = scmp.eq.s32.totalorder %s2226_s18, 0 }
   0x9   : > { %p66_p3 = scmp.ne.s32.totalorder %s2218_s16, %s2214_s15  ;;  %p67_p4 = scmp.eq.s32.totalorder %s2278_s19, 0 }
   0xa   : > { %s2294_s24 = scalar_select %p51_p1, %s2222_s17, %s53_s22  }
   0xb   : > { %p2296_p5 = por %p61_p2, %p60_p0  ;;  %p2300_p6 = por %p67_p4, %p66_p3 }
   0xc   : > { %p132_p7 = scmp.eq.s32.totalorder %s2278_s19, 1  ;;  %p138_p8 = scmp.eq.s32.totalorder %s1556_s20, 1 }
   0xd   : > { %p1958_p10 = scmp.lt.s32.totalorder %s2226_s18, 2  ;;  %s172_s29 = sand.u32 1, %s2222_s17  }
   0xe   : > { %p2307_p11 = por %p132_p7, %p60_p0  ;;  %p2311_p12 = por %p138_p8, %p66_p3 }
   0xf   : > { %s1643_s30 = sshll.u32 %s2226_s18, 7  ;;  %s1559_s5 = sshll.u32 %s172_s29, 3 }
  0x10   : > { %s3136_s27 = scalar_select %p2307_p11, 1, 0 }
  0x11   : > { %s3137_s28 = scalar_select %p2311_p12, 1, 0 }
  0x12   : > { %s2320_s8 = scalar_lea.hbm %s3108_s1, %s1643_s30  ;;  %s176_s9 = scalar_lea.vmem [#allocation2], %s1559_s5 }
  0x13   : > { %s184_s10 = sshll.u32 %s176_s9, 4  ;;  %p2324_p13 = pnand %p1958_p10, %p2296_p5  ;;  %s2328_s10 = int_to_ptr.vmem [resolvable:$true] %s184_s10 }
  0x14   : > { %s173_s12 = scalar_lea.sflag [#allocation3], %s172_s29  ;;  %s2130_s13 = scalar_lea.hbm %s2320_s8, 128 }
  0x15   : > { %p2131_p2 = scmp.ne.s32.totalorder %s2320_s8, %s2130_s13  ;;  %p2132_p3 = pneg %p2324_p13 }
  0x16   : > { %s2135_s22 = scalar_lea.hbm %s3108_s1, 256  ;;  %p2136_p5 = scmp.lt.u32.totalorder %s2320_s8, %s3108_s1 }
  0x17   : > { %p2133_p4 = pnand %p2132_p3, %p2131_p2  ;;  %p2137_p8 = scmp.lt.u32.totalorder %s2135_s22, %s2130_s13 }
  0x18   : > { %p2139_p9 = scmp.lt.u32.totalorder %s2130_s13, %s2320_s8 }
  0x19   : > { %p2134_p7 = pneg %p2133_p4  ;;  %p2138_p10 = por %p2137_p8, %p2136_p5 }
  0x1b   : > { %p2140_p0 = por %p2139_p9, %p2138_p10 }
  0x1d   : > { %p2141_p1 = pnand %p2140_p0, %p2134_p7 }
  0x1f   : > { %2144 = shalt.err (!%p2141_p1)
}
  0x20   : > { %s2145_s29 = scalar_lea.vmem %s2328_s10, 128  ;;  %s2228_s30 = smov [#allocation2]  }
  0x21   : > { %p2146_p2 = scmp.ne.s32.totalorder %s2328_s10, %s2145_s29  ;;  %s2150_s5 = sshll.u32 %s2228_s30, 4  ;;  %s2151_s5 = int_to_ptr.vmem [resolvable:$false] %s2150_s5 }
  0x22   : > { %s2152_s6 = scalar_lea.vmem %s2151_s5, 256  ;;  %p2153_p11 = scmp.lt.s32.totalorder %s2328_s10, %s2151_s5 }
  0x23   : > { %p2148_p4 = pnand %p2146_p2, %p2132_p3  ;;  %p2154_p5 = scmp.lt.s32.totalorder %s2152_s6, %s2145_s29 }
  0x25   : > { %p2149_p12 = pneg %p2148_p4  ;;  %p2155_p8 = por %p2154_p5, %p2153_p11 }
  0x27   : > { %p2156_p9 = pnand %p2155_p8, %p2149_p12 }
  0x29   : > { %2159 = shalt.err (!%p2156_p9)
}
  0x2a   : > { %1953 = dma.hbm_to_vmem [thread:$0]  (!%p2324_p13), %s2320_s8, 128, %s2328_s10, %s173_s12  }
  0x2b   : > { %p3139_p0 = scmp.lt.s32.totalorder %s2226_s18, 3  ;;  %p3140_p1 = scmp.ge.s32.totalorder %s2226_s18, 1 }
  0x2d   : > { %p190_p3 = pnand %p3140_p1, %p3139_p0 }
  0x2f   : > { %193 = sbr.rel (%p190_p3) target bundleno = 1455 (0x5af), region = 36 }
  0x36   : > { %s2362_s7 = sand.u32 1, %s2218_s16  }
  0x37   : > { %s1563_s9 = sshll.u32 %s2362_s7, 3  ;;  %s196_s13 = scalar_lea.sflag [#allocation3], %s2362_s7 }
  0x38   : > { %s2368_s11 = scalar_lea.vmem [#allocation2], %s1563_s9 }
  0x39   : > { %2205 = dma.done.wait (%p2300_p6), %s196_s13, 128  }
  0x3a   : > { %2207 = vsyncadd (%p2300_p6), %s196_s13, 4294967168  ;;  %p229_p11 = scmp.lt.s32.totalorder %s2278_s19, 1  ;;  %v2229_v0 = vmov 0.0   ;;  %v2230_v1 = vmov 4   ;;  %vm256_vm0 = vcmask 1043456   ;;  %v237_v3 = vld [vmem:[%s3109_s2 + $0x8] sm:$0xff] }
  0x3b   : > { %325 = vmatprep.mubr.f32.mxu1 %v2229_v0  ;;  %1994 = vset.pattern.permute.xlu0 %v2230_v1  ;;  %v2383_v5 = vld [vmem:[%s2368_s11] sm:$0xff]  ;;  %vm251_vm1 = vcmask 31744   ;;  %vm486_vm2 = vcmask 64512   ;;  %s2858_s5 = scalar_lea.vmem [#allocation5], %s1563_s9  ;;  %s1645_s6 = sshll.u32 %s2278_s19, 7 }
  0x3c   : > { %s230_s8 = scalar_select %p229_p11, %s2278_s19, 1  ;;  %3141 = vst [vmem:[#allocation8_spill] sm:$0xff] %v2383_v5  ;;  %246 = vperm.xlu0 %1994, %v237_v3   ;;  %v236_v6 = vld [vmem:[%s3109_s2] sm:$0xff]  ;;  %v344_v7 = vcombine.high %v2383_v5, %v2383_v5 }
  0x3d   : > { %v238_v8 = vld [vmem:[%s3110_s3] sm:$0x1f]  ;;  %s1474_s9 = sshll.u32 %s2858_s5, 4  ;;  %s1460_s12 = scalar_lea.sflag [#allocation4], %s2362_s7  ;;  %s3064_s9 = int_to_ptr.vmem [resolvable:$true] %s1474_s9 }
  0x3e   : > { %s1644_s10 = sshll.u32 %s230_s8, 3  ;;  %s2160_s14 = scalar_lea.vmem %s3064_s9, 128 }
  0x3f   : > { %s233_s20 = scalar_lea.vmem %s3107_s0, %s1644_s10  ;;  %s3062_s10 = scalar_lea.hbm %s3111_s4, %s1645_s6 }
  0x40   : > { %v234_v2 = vld [vmem:[%s233_s20] sm:$0xff]  ;;  %241 = vperm.xlu0 %1994, %v236_v6   ;;  %p2161_p6 = scmp.ne.s32.totalorder %s3064_s9, %s2160_s14  ;;  %p3187_p12 = scmp.ne.s32.totalorder %s3136_s27, 0 }
  0x41   : > { %v250_v4 = vcombine.high %v234_v2, %v234_v2  ;;  %s2231_s19 = smov [#allocation5]  }
  0x42   : > { %p2162_p13 = pnand %p2161_p6, %p3187_p12 }
  0x43   : > { %1567 = vmatprep.subr.msk.mxu1 %vm256_vm0, %v250_v4 }
  0x44   : > { %1568 = vmatpush1.msk.msra.mxu1 %vm256_vm0, %v234_v2  ;;  %340 = vperm.xlu0 %1994, %v238_v8   ;;  %p2163_p7 = pneg %p2162_p13 }
  0x45   : > { %1569 = vmatmul.mubr.msk.f32.vlgmr.msra.gmra.mrb[0].mxu1 %vm251_vm1, %v236_v6  ;;  %1571 = vmatprep.subr.msk.mxu1 %vm256_vm0, %v344_v7 }
  0x46   : > { %331 = vmatprep.mubr.f32.mxu1 %v2229_v0  ;;  %1572 = vmatpush1.msk.msra.mxu1 %vm256_vm0, %v2383_v5 }
  0x49   : > { %1570 = vmatmul.mubr.msk.f32.gmra.mrb[2].mxu1 %vm251_vm1, %v237_v3 }
  0x4a   : > { %415 = vmatprep.mubr.f32.mxu1 %v2229_v0 }
  0x4d   : > { %1573 = vmatmul.mubr.msk.f32.vlgmr.msra.gmra.mrb[4].mxu1 %vm251_vm1, %v238_v8 }
  0xbb   : > { %v247_v9 = vpop.permute.xlu0 %246 }
  0xbf   : > { %v2394_v10 = vpop.permute.xlu0 %241 }
  0xc3   : > { %v341_v17 = vpop.permute.xlu0 %340 }
 0x118   : > { %v327_v11 = vpop.f32.mrb[0].mxu1 }
 0x119   : > { %v328_v12 = vadd.f32 %v327_v11, %v2394_v10  ;;  %v2397_v13 = vpop.f32.mrb[1].mxu1 }
 0x11b   : > { %1782 = vmatprep.subr.mxu1 %v328_v12 }
 0x11c   : > { %v333_v14 = vpop.f32.mrb[2].mxu1  ;;  %1783 = vmatpush3.msra.mxu1 %v328_v12 }
 0x11d   : > { %v335_v15 = vpop.f32.mrb[3].mxu1  ;;  %v334_v16 = vadd.f32 %v333_v14, %v247_v9 }
 0x11e   : > { %v336_v22 = vadd.f32 %v335_v15, %v247_v9 }
 0x11f   : > { %422 = vxpose.xlu1.b32.start.end [1/1] (short) %v334_v16, 128 }
 0x120   : > { %v417_v18 = vpop.f32.mrb[4].mxu1 }
 0x121   : > { %v2399_v19 = vadd.f32 %v417_v18, %v341_v17  ;;  %v419_v20 = vpop.f32.mrb[5].mxu1 }
 0x122   : > { %v2401_v21 = vadd.f32 %v419_v20, %v341_v17 }
 0x124   : > { %1005 = vmatprep.mubr.f32.mxu0 %v2401_v21 }
 0x15c   : > { %454 = vxpose.xlu1.b32.start.end [1/1] (short) %v336_v22, 128 }
 0x19f   : > { %v2404_v23 = vpop.trf.xlu1 }
 0x1a0   : > { %1784 = vmatprep.mubr.msk.f32.mxu1 %vm486_vm2, %v2404_v23 }
 0x1a3   : > { %v2408_v24 = vpop.trf.xlu1 }
 0x1a4   : > { %1785 = vmatmul.mubr.msk.f32.vlgmr.msra.gmra.mrb[6].mxu1 %vm486_vm2, %v2408_v24 }
 0x1a7   : > { %v2412_v25 = vpop.trf.xlu1 }
 0x1a8   : > { %1787 = vmatprep.mubr.msk.f32.mxu1 %vm486_vm2, %v2412_v25 }
 0x1ab   : > { %v2416_v26 = vpop.trf.xlu1 }
 0x1ac   : > { %1788 = vmatmul.mubr.msk.f32.gmra.mrb[8].mxu1 %vm486_vm2, %v2416_v26 }
 0x1af   : > { %v2420_v27 = vpop.trf.xlu1 }
 0x1b0   : > { %1790 = vmatprep.mubr.msk.f32.mxu1 %vm486_vm2, %v2420_v27 }
 0x1b3   : > { %v2424_v28 = vpop.trf.xlu1 }
 0x1b4   : > { %1791 = vmatmul.mubr.msk.f32.gmra.mrb[10].mxu1 %vm486_vm2, %v2424_v28 }
 0x1b7   : > { %v2428_v29 = vpop.trf.xlu1 }
 0x1b8   : > { %1793 = vmatprep.mubr.msk.f32.mxu1 %vm486_vm2, %v2428_v29 }
 0x1bb   : > { %v2432_v30 = vpop.trf.xlu1 }
 0x1bc   : > { %1794 = vmatmul.mubr.msk.f32.gmra.mrb[12].mxu1 %vm486_vm2, %v2432_v30 }
 0x1bf   : > { %v2436_v31 = vpop.trf.xlu1 }
 0x1c0   : > { %1796 = vmatprep.mubr.msk.f32.mxu1 %vm486_vm2, %v2436_v31 }
 0x1c3   : > { %v2440_v32 = vpop.trf.xlu1 }
 0x1c4   : > { %1797 = vmatmul.mubr.msk.f32.gmra.mrb[14].mxu1 %vm486_vm2, %v2440_v32 }
 0x1c7   : > { %v2444_v33 = vpop.trf.xlu1 }
 0x1c8   : > { %1799 = vmatprep.mubr.msk.f32.mxu1 %vm486_vm2, %v2444_v33 }
 0x1cb   : > { %v2448_v34 = vpop.trf.xlu1 }
 0x1cc   : > { %1800 = vmatmul.mubr.msk.f32.gmra.mrb[16].mxu1 %vm486_vm2, %v2448_v34 }
 0x1cf   : > { %v2452_v35 = vpop.trf.xlu1 }
 0x1d0   : > { %3142 = vst [vmem:[#allocation9_spill] sm:$0xff] %v2452_v35  ;;  %1802 = vmatprep.mubr.msk.f32.mxu1 %vm486_vm2, %v2452_v35 }
 0x1d3   : > { %v2456_v36 = vpop.trf.xlu1 }
 0x1d4   : > { %3143 = vst [vmem:[#allocation10_spill] sm:$0xff] %v2456_v36  ;;  %1803 = vmatmul.mubr.msk.f32.gmra.mrb[18].mxu1 %vm486_vm2, %v2456_v36 }
 0x1d7   : > { %v2460_v37 = vpop.trf.xlu1 }
 0x1d8   : > { %3144 = vst [vmem:[#allocation11_spill] sm:$0xff] %v2460_v37  ;;  %1805 = vmatprep.mubr.msk.f32.mxu1 %vm486_vm2, %v2460_v37 }
 0x1db   : > { %v2464_v38 = vpop.trf.xlu1 }
 0x1dc   : > { %3145 = vst [vmem:[#allocation12_spill] sm:$0xff] %v2464_v38  ;;  %1806 = vmatmul.mubr.msk.f32.gmra.mrb[20].mxu1 %vm486_vm2, %v2464_v38 }
 0x1df   : > { %v2468_v39 = vpop.trf.xlu1 }
 0x1e0   : > { %3146 = vst [vmem:[#allocation13_spill] sm:$0xff] %v2468_v39  ;;  %1808 = vmatprep.mubr.msk.f32.mxu1 %vm486_vm2, %v2468_v39 }
 0x1e3   : > { %v2472_v40 = vpop.trf.xlu1 }
 0x1e4   : > { %3147 = vst [vmem:[#allocation14_spill] sm:$0xff] %v2472_v40  ;;  %1809 = vmatmul.mubr.msk.f32.gmra.mrb[22].mxu1 %vm486_vm2, %v2472_v40 }
 0x1e7   : > { %v2476_v41 = vpop.trf.xlu1 }
 0x1e8   : > { %3148 = vst [vmem:[#allocation15_spill] sm:$0xff] %v2476_v41  ;;  %1811 = vmatprep.mubr.msk.f32.mxu1 %vm486_vm2, %v2476_v41 }
 0x1eb   : > { %v2480_v42 = vpop.trf.xlu1 }
 0x1ec   : > { %3149 = vst [vmem:[#allocation16_spill] sm:$0xff] %v2480_v42  ;;  %1812 = vmatmul.mubr.msk.f32.gmra.mrb[24].mxu1 %vm486_vm2, %v2480_v42 }
 0x1ef   : > { %v2484_v43 = vpop.trf.xlu1 }
 0x1f0   : > { %3150 = vst [vmem:[#allocation17_spill] sm:$0xff] %v2484_v43  ;;  %1814 = vmatprep.mubr.msk.f32.mxu1 %vm486_vm2, %v2484_v43 }
 0x1f3   : > { %v2488_v44 = vpop.trf.xlu1 }
 0x1f4   : > { %3151 = vst [vmem:[#allocation18_spill] sm:$0xff] %v2488_v44  ;;  %1815 = vmatmul.mubr.msk.f32.gmra.mrb[26].mxu1 %vm486_vm2, %v2488_v44 }
 0x1f7   : > { %v2492_v45 = vpop.trf.xlu1 }
 0x1f8   : > { %3152 = vst [vmem:[#allocation19_spill] sm:$0xff] %v2492_v45  ;;  %1817 = vmatprep.mubr.msk.f32.mxu1 %vm486_vm2, %v2492_v45 }
 0x1fb   : > { %v2496_v46 = vpop.trf.xlu1 }
 0x1fc   : > { %3153 = vst [vmem:[#allocation20_spill] sm:$0xff] %v2496_v46  ;;  %1818 = vmatmul.mubr.msk.f32.gmra.mrb[28].mxu1 %vm486_vm2, %v2496_v46 }
 0x1ff   : > { %v2500_v47 = vpop.trf.xlu1 }
 0x200   : > { %3154 = vst [vmem:[#allocation21_spill] sm:$0xff] %v2500_v47  ;;  %1820 = vmatprep.mubr.msk.f32.mxu1 %vm486_vm2, %v2500_v47 }
 0x203   : > { %v2504_v48 = vpop.trf.xlu1 }
 0x204   : > { %3155 = vst [vmem:[#allocation22_spill] sm:$0xff] %v2504_v48  ;;  %1821 = vmatmul.mubr.msk.f32.gmra.mrb[30].mxu1 %vm486_vm2, %v2504_v48 }
 0x207   : > { %v2508_v49 = vpop.trf.xlu1 }
 0x208   : > { %3156 = vst [vmem:[#allocation23_spill] sm:$0xff] %v2508_v49  ;;  %1823 = vmatprep.mubr.msk.f32.mxu1 %vm486_vm2, %v2508_v49 }
 0x20b   : > { %v2512_v50 = vpop.trf.xlu1 }
 0x20c   : > { %3157 = vst [vmem:[#allocation24_spill] sm:$0xff] %v2512_v50  ;;  %1824 = vmatmul.mubr.msk.f32.gmra.mrb[32].mxu1 %vm486_vm2, %v2512_v50 }
 0x20f   : > { %v2516_v51 = vpop.trf.xlu1 }
 0x210   : > { %3158 = vst [vmem:[#allocation25_spill] sm:$0xff] %v2516_v51  ;;  %1826 = vmatprep.mubr.msk.f32.mxu1 %vm486_vm2, %v2516_v51 }
 0x213   : > { %v2520_v52 = vpop.trf.xlu1 }
 0x214   : > { %3159 = vst [vmem:[#allocation26_spill] sm:$0xff] %v2520_v52  ;;  %1827 = vmatmul.mubr.msk.f32.gmra.mrb[34].mxu1 %vm486_vm2, %v2520_v52 }
 0x217   : > { %v2524_v53 = vpop.trf.xlu1 }
 0x218   : > { %3160 = vst [vmem:[#allocation27_spill] sm:$0xff] %v2524_v53  ;;  %1829 = vmatprep.mubr.msk.f32.mxu1 %vm486_vm2, %v2524_v53 }
 0x21b   : > { %v2528_v54 = vpop.trf.xlu1 }
 0x21c   : > { %3161 = vst [vmem:[#allocation28_spill] sm:$0xff] %v2528_v54  ;;  %1830 = vmatmul.mubr.msk.f32.gmra.mrb[36].mxu1 %vm486_vm2, %v2528_v54 }
 0x21d   : > { %1442 = vmatprep.mubr.f32.mxu1 %v2401_v21 }
 0x277   : > { %v2533_v55 = vpop.f32.mrb[6].mxu1 }
 0x278   : > { %v2535_v56 = vpop.f32.mrb[7].mxu1 }
 0x27f   : > { %v2537_v57 = vpop.f32.mrb[8].mxu1 }
 0x280   : > { %v2539_v58 = vpop.f32.mrb[9].mxu1 }
 0x287   : > { %v2541_v59 = vpop.f32.mrb[10].mxu1 }
 0x288   : > { %v809_v60 = vmax.f32 %v2533_v55, %v2541_v59  ;;  %v2545_v61 = vpop.f32.mrb[11].mxu1 }
 0x289   : > { %v808_v62 = vmax.f32 %v2535_v56, %v2545_v61 }
 0x28f   : > { %v2549_v63 = vpop.f32.mrb[12].mxu1 }
 0x290   : > { %v811_v0 = vmax.f32 %v2537_v57, %v2549_v63  ;;  %v2553_v1 = vpop.f32.mrb[13].mxu1 }
 0x291   : > { %v810_v2 = vmax.f32 %v2539_v58, %v2553_v1 }
 0x297   : > { %v2557_v3 = vpop.f32.mrb[14].mxu1 }
 0x298   : > { %v813_v4 = vmax.f32 %v809_v60, %v2557_v3  ;;  %v2560_v6 = vpop.f32.mrb[15].mxu1 }
 0x299   : > { %v812_v7 = vmax.f32 %v808_v62, %v2560_v6 }
 0x29f   : > { %v2563_v8 = vpop.f32.mrb[16].mxu1 }
 0x2a0   : > { %v815_v9 = vmax.f32 %v811_v0, %v2563_v8  ;;  %v2566_v11 = vpop.f32.mrb[17].mxu1 }
 0x2a1   : > { %v814_v12 = vmax.f32 %v810_v2, %v2566_v11 }
 0x2a7   : > { %v2569_v14 = vpop.f32.mrb[18].mxu1 }
 0x2a8   : > { %v817_v15 = vmax.f32 %v813_v4, %v2569_v14  ;;  %v2572_v16 = vpop.f32.mrb[19].mxu1 }
 0x2a9   : > { %v816_v17 = vmax.f32 %v812_v7, %v2572_v16 }
 0x2af   : > { %v2575_v18 = vpop.f32.mrb[20].mxu1 }
 0x2b0   : > { %v819_v20 = vmax.f32 %v815_v9, %v2575_v18  ;;  %v2578_v21 = vpop.f32.mrb[21].mxu1 }
 0x2b1   : > { %v818_v22 = vmax.f32 %v814_v12, %v2578_v21 }
 0x2b7   : > { %v2581_v60 = vpop.f32.mrb[22].mxu1 }
 0x2b8   : > { %v821_v62 = vmax.f32 %v817_v15, %v2581_v60  ;;  %v2584_v0 = vpop.f32.mrb[23].mxu1 }
 0x2b9   : > { %v820_v2 = vmax.f32 %v816_v17, %v2584_v0 }
 0x2bf   : > { %v2587_v4 = vpop.f32.mrb[24].mxu1 }
 0x2c0   : > { %v823_v7 = vmax.f32 %v819_v20, %v2587_v4  ;;  %v2590_v5 = vpop.f32.mrb[25].mxu1 }
 0x2c1   : > { %v822_v9 = vmax.f32 %v818_v22, %v2590_v5 }
 0x2c7   : > { %v2593_v54 = vpop.f32.mrb[26].mxu1 }
 0x2c8   : > { %v825_v12 = vmax.f32 %v821_v62, %v2593_v54  ;;  %v2596_v53 = vpop.f32.mrb[27].mxu1 }
 0x2c9   : > { %v824_v15 = vmax.f32 %v820_v2, %v2596_v53 }
 0x2cf   : > { %v2599_v52 = vpop.f32.mrb[28].mxu1 }
 0x2d0   : > { %v827_v17 = vmax.f32 %v823_v7, %v2599_v52  ;;  %v2602_v51 = vpop.f32.mrb[29].mxu1 }
 0x2d1   : > { %v826_v20 = vmax.f32 %v822_v9, %v2602_v51 }
 0x2d7   : > { %v2605_v50 = vpop.f32.mrb[30].mxu1 }
 0x2d8   : > { %v829_v22 = vmax.f32 %v825_v12, %v2605_v50  ;;  %v2608_v49 = vpop.f32.mrb[31].mxu1 }
 0x2d9   : > { %v828_v62 = vmax.f32 %v824_v15, %v2608_v49 }
 0x2df   : > { %v2611_v48 = vpop.f32.mrb[32].mxu1 }
 0x2e0   : > { %v831_v2 = vmax.f32 %v827_v17, %v2611_v48  ;;  %v2614_v47 = vpop.f32.mrb[33].mxu1 }
 0x2e1   : > { %v830_v7 = vmax.f32 %v826_v20, %v2614_v47 }
 0x2e7   : > { %v2617_v46 = vpop.f32.mrb[34].mxu1 }
 0x2e8   : > { %v833_v9 = vmax.f32 %v829_v22, %v2617_v46  ;;  %v2620_v45 = vpop.f32.mrb[35].mxu1 }
 0x2e9   : > { %v832_v12 = vmax.f32 %v828_v62, %v2620_v45 }
 0x2eb   : > { %v836_v44 = vmax.f32 %v832_v12, %v833_v9 }
 0x2ef   : > { %v2623_v43 = vpop.f32.mrb[36].mxu1 }
 0x2f0   : > { %v835_v15 = vmax.f32 %v831_v2, %v2623_v43  ;;  %v799_v42 = vpop.f32.mrb[37].mxu1 }
 0x2f1   : > { %v834_v41 = vmax.f32 %v830_v7, %v799_v42 }
 0x2f3   : > { %v837_v17 = vmax.f32 %v834_v41, %v835_v15 }
 0x2f5   : > { %v838_v40 = vmax.f32 %v836_v44, %v837_v17 }
 0x2f7   : > { %v839_v39 = vrot.slane %v838_v40, 4 }
 0x2f9   : > { %v840_v38 = vmax.f32 %v838_v40, %v839_v39 }
 0x2fb   : > { %v841_v20 = vrot.slane %v840_v38, 2 }
 0x2fd   : > { %v842_v37 = vmax.f32 %v840_v38, %v841_v20 }
 0x2ff   : > { %v843_v36 = vrot.slane %v842_v37, 1 }
 0x301   : > { %v2626_v35 = vmax.f32 %v842_v37, %v843_v36 }
 0x303   : > { %v875_v22 = vsub.f32 %v799_v42, %v2626_v35  ;;  %v845_v62 = vsub.f32 %v2535_v56, %v2626_v35  ;;  %v846_v9 = vsub.f32 %v2533_v55, %v2626_v35  ;;  %v847_v2 = vsub.f32 %v2539_v58, %v2626_v35 }
 0x304   : > { %v848_v41 = vsub.f32 %v2537_v57, %v2626_v35  ;;  %v849_v38 = vsub.f32 %v2545_v61, %v2626_v35  ;;  %v850_v36 = vsub.f32 %v2541_v59, %v2626_v35  ;;  %v851_v37 = vsub.f32 %v2553_v1, %v2626_v35 }
 0x305   : > { %v852_v39 = vsub.f32 %v2549_v63, %v2626_v35  ;;  %v853_v40 = vsub.f32 %v2560_v6, %v2626_v35  ;;  %v854_v42 = vsub.f32 %v2557_v3, %v2626_v35  ;;  %v855_v44 = vsub.f32 %v2566_v11, %v2626_v35 }
 0x306   : > { %v856_v55 = vsub.f32 %v2563_v8, %v2626_v35  ;;  %v857_v56 = vsub.f32 %v2572_v16, %v2626_v35  ;;  %v858_v57 = vsub.f32 %v2569_v14, %v2626_v35  ;;  %v937_v58 = vmul.f32 1.442695, %v875_v22 }
 0x307   : > { %v859_v59 = vsub.f32 %v2578_v21, %v2626_v35  ;;  %v860_v61 = vsub.f32 %v2575_v18, %v2626_v35  ;;  %v861_v63 = vsub.f32 %v2584_v0, %v2626_v35  ;;  %v862_v1 = vsub.f32 %v2581_v60, %v2626_v35 }
 0x308   : > { %v863_v3 = vsub.f32 %v2590_v5, %v2626_v35  ;;  %v864_v6 = vsub.f32 %v2587_v4, %v2626_v35  ;;  %v865_v8 = vsub.f32 %v2596_v53, %v2626_v35  ;;  %v866_v11 = vsub.f32 %v2593_v54, %v2626_v35 }
 0x309   : > { %v867_v14 = vsub.f32 %v2602_v51, %v2626_v35  ;;  %v868_v16 = vsub.f32 %v2599_v52, %v2626_v35  ;;  %v869_v18 = vsub.f32 %v2608_v49, %v2626_v35  ;;  %v870_v5 = vsub.f32 %v2605_v50, %v2626_v35 }
 0x30a   : > { %v876_v0 = vsub.f32 %v2623_v43, %v2626_v35  ;;  %v877_v4 = vmul.f32 1.442695, %v845_v62  ;;  %v879_v7 = vmul.f32 1.442695, %v846_v9  ;;  %1997 = vpow2.f32 %v937_v58 }
 0x30b   : > { %v881_v12 = vmul.f32 1.442695, %v847_v2  ;;  %v883_v15 = vmul.f32 1.442695, %v848_v41  ;;  %v885_v17 = vmul.f32 1.442695, %v849_v38  ;;  %v3162_v52 = vsub.f32 %v2614_v47, %v2626_v35 }
 0x30c   : > { %1999 = vpow2.f32 %v877_v4  ;;  %v887_v20 = vmul.f32 1.442695, %v850_v36  ;;  %v889_v22 = vmul.f32 1.442695, %v851_v37  ;;  %v891_v53 = vmul.f32 1.442695, %v852_v39 }
 0x30d   : > { %2001 = vpow2.f32 %v879_v7  ;;  %v893_v54 = vmul.f32 1.442695, %v853_v40  ;;  %v895_v60 = vmul.f32 1.442695, %v854_v42  ;;  %v897_v21 = vmul.f32 1.442695, %v855_v44 }
 0x30e   : > { %2003 = vpow2.f32 %v881_v12  ;;  %v899_v62 = vmul.f32 1.442695, %v856_v55  ;;  %v901_v9 = vmul.f32 1.442695, %v857_v56  ;;  %v903_v41 = vmul.f32 1.442695, %v858_v57 }
 0x30f   : > { %2005 = vpow2.f32 %v883_v15  ;;  %v905_v36 = vmul.f32 1.442695, %v859_v59  ;;  %v907_v39 = vmul.f32 1.442695, %v860_v61  ;;  %v909_v42 = vmul.f32 1.442695, %v861_v63 }
 0x310   : > { %2007 = vpow2.f32 %v885_v17  ;;  %v911_v56 = vmul.f32 1.442695, %v862_v1  ;;  %v913_v58 = vmul.f32 1.442695, %v863_v3  ;;  %v915_v61 = vmul.f32 1.442695, %v864_v6 }
 0x311   : > { %2009 = vpow2.f32 %v887_v20  ;;  %v917_v63 = vmul.f32 1.442695, %v865_v8  ;;  %v919_v1 = vmul.f32 1.442695, %v866_v11  ;;  %v921_v3 = vmul.f32 1.442695, %v867_v14 }
 0x312   : > { %2011 = vpow2.f32 %v889_v22  ;;  %v923_v8 = vmul.f32 1.442695, %v868_v16  ;;  %v925_v11 = vmul.f32 1.442695, %v869_v18  ;;  %v927_v15 = vmul.f32 1.442695, %v870_v5 }
 0x313   : > { %2013 = vpow2.f32 %v891_v53  ;;  %v929_v16 = vmul.f32 1.442695, %v3162_v52  ;;  %v3163_v49 = vsub.f32 %v2611_v48, %v2626_v35  ;;  %v3165_v47 = vsub.f32 %v2617_v46, %v2626_v35 }
 0x314   : > { %2015 = vpow2.f32 %v893_v54  ;;  %v2691_v2 = vpop.eup %1997  ;;  %v939_v48 = vmul.f32 1.442695, %v876_v0 }
 0x315   : > { %2017 = vpow2.f32 %v895_v60  ;;  %v931_v18 = vmul.f32 1.442695, %v3163_v49 }
 0x316   : > { %v2693_v38 = vpop.eup %1999  ;;  %2019 = vpow2.f32 %v897_v21 }
 0x317   : > { %v2695_v37 = vpop.eup %2001  ;;  %2021 = vpow2.f32 %v899_v62 }
 0x318   : > { %v2697_v40 = vpop.eup %2003  ;;  %2023 = vpow2.f32 %v901_v9  ;;  %v1884_v44 = vpack.c.bf16 %v2695_v37, %v2693_v38  ;;  %v3164_v9 = vsub.f32 %v2620_v45, %v2626_v35  ;;  %v935_v38 = vmul.f32 1.442695, %v3165_v47 }
 0x319   : > { %v2701_v55 = vpop.eup %2005  ;;  %2025 = vpow2.f32 %v903_v41 }
 0x31a   : > { %v2703_v57 = vpop.eup %2007  ;;  %2027 = vpow2.f32 %v905_v36  ;;  %v1888_v59 = vpack.c.bf16 %v2701_v55, %v2697_v40  ;;  %v933_v50 = vmul.f32 1.442695, %v3164_v9 }
 0x31b   : > { %v2707_v21 = vpop.eup %2009  ;;  %2029 = vpow2.f32 %v907_v39 }
 0x31c   : > { %v2709_v53 = vpop.eup %2011  ;;  %2031 = vpow2.f32 %v909_v42  ;;  %v1892_v54 = vpack.c.bf16 %v2707_v21, %v2703_v57  ;;  %v3181_v57 = vld [vmem:[#allocation24_spill] sm:$0xff]  ;;  %v3182_v21 = vld [vmem:[#allocation25_spill] sm:$0xff] }
 0x31d   : > { %v2713_v60 = vpop.eup %2013  ;;  %2033 = vpow2.f32 %v911_v56 }
 0x31e   : > { %v2715_v4 = vpop.eup %2015  ;;  %2035 = vpow2.f32 %v913_v58  ;;  %v1896_v6 = vpack.c.bf16 %v2713_v60, %v2709_v53 }
 0x31f   : > { %v2722_v7 = vpop.eup %2017  ;;  %2037 = vpow2.f32 %v915_v61 }
 0x320   : > { %v2020_v12 = vpop.eup %2019  ;;  %2039 = vpow2.f32 %v917_v63  ;;  %v1900_v51 = vpack.c.bf16 %v2722_v7, %v2715_v4 }
 0x321   : > { %v2022_v14 = vpop.eup %2021  ;;  %2041 = vpow2.f32 %v919_v1 }
 0x322   : > { %v2024_v17 = vpop.eup %2023  ;;  %2043 = vpow2.f32 %v921_v3  ;;  %v1904_v20 = vpack.c.bf16 %v2022_v14, %v2020_v12 }
 0x323   : > { %v2026_v22 = vpop.eup %2025  ;;  %2045 = vpow2.f32 %v923_v8 }
 0x324   : > { %v2028_v62 = vpop.eup %2027  ;;  %2047 = vpow2.f32 %v925_v11  ;;  %v1908_v5 = vpack.c.bf16 %v2026_v22, %v2024_v17  ;;  %v3185_v11 = vld [vmem:[#allocation28_spill] sm:$0xff]  ;;  %v1013_v17 = vlaneseq }
 0x325   : > { %v2030_v41 = vpop.eup %2029  ;;  %2049 = vpow2.f32 %v927_v15 }
 0x326   : > { %v2032_v36 = vpop.eup %2031  ;;  %2051 = vpow2.f32 %v929_v16  ;;  %v1912_v37 = vpack.c.bf16 %v2030_v41, %v2028_v62 }
 0x327   : > { %v2034_v39 = vpop.eup %2033  ;;  %2053 = vpow2.f32 %v931_v18 }
 0x328   : > { %v2036_v40 = vpop.eup %2035  ;;  %2055 = vpow2.f32 %v933_v50  ;;  %v1882_v45 = vpack.c.bf16 %v2034_v39, %v2032_v36 }
 0x329   : > { %v2038_v42 = vpop.eup %2037  ;;  %2057 = vpow2.f32 %v935_v38 }
 0x32a   : > { %v2040_v55 = vpop.eup %2039  ;;  %2059 = vpow2.f32 %v939_v48  ;;  %1883 = vmatprep.subr.bf16.mxu0 %v1882_v45  ;;  %v1886_v56 = vpack.c.bf16 %v2038_v42, %v2036_v40  ;;  %v3186_v40 = vld [vmem:[#allocation8_spill] sm:$0xff] }
 0x32b   : > { %v2042_v46 = vpop.eup %2041  ;;  %1885 = vmatpush3.bf16.msra.mxu0 %v1884_v44 }
 0x32c   : > { %v2044_v58 = vpop.eup %2043  ;;  %1887 = vmatprep.subr.bf16.mxu0 %v1886_v56  ;;  %v1890_v61 = vpack.c.bf16 %v2042_v46, %v2040_v55 }
 0x32d   : > { %v2046_v53 = vpop.eup %2045 }
 0x32e   : > { %v2048_v35 = vpop.eup %2047  ;;  %v1894_v43 = vpack.c.bf16 %v2046_v53, %v2044_v58 }
 0x32f   : > { %v2050_v0 = vpop.eup %2049  ;;  %1889 = vmatpush3.bf16.msra.mxu0 %v1888_v59  ;;  %v330_v59 = vadd.f32 %v2397_v13, %v2394_v10  ;;  %v3166_v10 = vld [vmem:[#allocation9_spill] sm:$0xff]  ;;  %v3167_v13 = vld [vmem:[#allocation10_spill] sm:$0xff] }
 0x330   : > { %v2052_v63 = vpop.eup %2051  ;;  %1891 = vmatprep.subr.bf16.mxu0 %v1890_v61  ;;  %v1898_v60 = vpack.c.bf16 %v2050_v0, %v2048_v35 }
 0x331   : > { %v2054_v1 = vpop.eup %2053 }
 0x332   : > { %v2056_v4 = vpop.eup %2055  ;;  %v1902_v3 = vpack.c.bf16 %v2054_v1, %v2052_v63 }
 0x333   : > { %v2058_v7 = vpop.eup %2057  ;;  %1893 = vmatpush3.bf16.msra.mxu0 %v1892_v54  ;;  %v3183_v54 = vld [vmem:[#allocation26_spill] sm:$0xff] }
 0x334   : > { %v2060_v44 = vpop.eup %2059  ;;  %1895 = vmatprep.subr.bf16.mxu0 %v1894_v43  ;;  %v1906_v8 = vpack.c.bf16 %v2058_v7, %v2056_v4 }
 0x335   : > { %v1910_v12 = vpack.c.bf16 %v2060_v44, %v2691_v2  ;;  %v3180_v2 = vld [vmem:[#allocation23_spill] sm:$0xff] }
 0x337   : > { %1897 = vmatpush3.bf16.msra.mxu0 %v1896_v6  ;;  %v3184_v6 = vld [vmem:[#allocation27_spill] sm:$0xff] }
 0x338   : > { %1899 = vmatprep.subr.bf16.mxu0 %v1898_v60 }
 0x33b   : > { %1901 = vmatpush3.bf16.msra.mxu0 %v1900_v51 }
 0x33c   : > { %1903 = vmatprep.subr.bf16.mxu0 %v1902_v3 }
 0x33f   : > { %1905 = vmatpush3.bf16.msra.mxu0 %v1904_v20  ;;  %v2825_v20 = vshrl.u32 %v1013_v17, 7 }
 0x340   : > { %1907 = vmatprep.subr.bf16.mxu0 %v1906_v8 }
 0x341   : > { %v1015_v18 = vsub.s32 4, %v2825_v20 }
 0x343   : > { %1909 = vmatpush3.bf16.msra.mxu0 %v1908_v5 }
 0x344   : > { %1911 = vmatprep.subr.bf16.mxu0 %v1910_v12 }
 0x347   : > { %1913 = vmatpush3.bf16.msra.mxu0 %v1912_v37 }
 0x348   : > { %1832 = vmatprep.subr.mxu0 %v330_v59 }
 0x34a   : > { %1006 = vmatmul.mubr.f32.vlgmr.msra.gmra.mrb[0].mxu0 %v2399_v19 }
 0x34b   : > { %1833 = vmatpush3.msra.mxu0 %v330_v59  ;;  %1834 = vmatprep.mubr.msk.f32.mxu0 %vm486_vm2, %v2404_v23  ;;  %v3168_v23 = vld [vmem:[#allocation11_spill] sm:$0xff] }
 0x34e   : > { %1835 = vmatmul.mubr.msk.f32.vlgmr.msra.gmra.mrb[2].mxu0 %vm486_vm2, %v2408_v24  ;;  %v3169_v24 = vld [vmem:[#allocation12_spill] sm:$0xff] }
 0x34f   : > { %1837 = vmatprep.mubr.msk.f32.mxu0 %vm486_vm2, %v2412_v25  ;;  %v3170_v25 = vld [vmem:[#allocation13_spill] sm:$0xff] }
 0x352   : > { %1838 = vmatmul.mubr.msk.f32.gmra.mrb[4].mxu0 %vm486_vm2, %v2416_v26  ;;  %v3171_v26 = vld [vmem:[#allocation14_spill] sm:$0xff] }
 0x353   : > { %1840 = vmatprep.mubr.msk.f32.mxu0 %vm486_vm2, %v2420_v27  ;;  %v3172_v27 = vld [vmem:[#allocation15_spill] sm:$0xff] }
 0x356   : > { %1841 = vmatmul.mubr.msk.f32.gmra.mrb[6].mxu0 %vm486_vm2, %v2424_v28  ;;  %v3173_v28 = vld [vmem:[#allocation16_spill] sm:$0xff] }
 0x357   : > { %1843 = vmatprep.mubr.msk.f32.mxu0 %vm486_vm2, %v2428_v29  ;;  %v3174_v29 = vld [vmem:[#allocation17_spill] sm:$0xff] }
 0x35a   : > { %1844 = vmatmul.mubr.msk.f32.gmra.mrb[8].mxu0 %vm486_vm2, %v2432_v30  ;;  %v3175_v30 = vld [vmem:[#allocation18_spill] sm:$0xff] }
 0x35b   : > { %1846 = vmatprep.mubr.msk.f32.mxu0 %vm486_vm2, %v2436_v31  ;;  %v3176_v31 = vld [vmem:[#allocation19_spill] sm:$0xff] }
 0x35e   : > { %1847 = vmatmul.mubr.msk.f32.gmra.mrb[10].mxu0 %vm486_vm2, %v2440_v32  ;;  %v3177_v32 = vld [vmem:[#allocation20_spill] sm:$0xff] }
 0x35f   : > { %1849 = vmatprep.mubr.msk.f32.mxu0 %vm486_vm2, %v2444_v33  ;;  %v3178_v33 = vld [vmem:[#allocation21_spill] sm:$0xff] }
 0x362   : > { %1850 = vmatmul.mubr.msk.f32.gmra.mrb[12].mxu0 %vm486_vm2, %v2448_v34  ;;  %v3179_v34 = vld [vmem:[#allocation22_spill] sm:$0xff] }
 0x363   : > { %1852 = vmatprep.mubr.msk.f32.mxu0 %vm486_vm2, %v3166_v10 }
 0x366   : > { %1853 = vmatmul.mubr.msk.f32.gmra.mrb[14].mxu0 %vm486_vm2, %v3167_v13 }
 0x367   : > { %1855 = vmatprep.mubr.msk.f32.mxu0 %vm486_vm2, %v3168_v23 }
 0x36a   : > { %1856 = vmatmul.mubr.msk.f32.gmra.mrb[16].mxu0 %vm486_vm2, %v3169_v24 }
 0x36b   : > { %1858 = vmatprep.mubr.msk.f32.mxu0 %vm486_vm2, %v3170_v25 }
 0x36e   : > { %1859 = vmatmul.mubr.msk.f32.gmra.mrb[18].mxu0 %vm486_vm2, %v3171_v26 }
 0x36f   : > { %1861 = vmatprep.mubr.msk.f32.mxu0 %vm486_vm2, %v3172_v27 }
 0x372   : > { %1862 = vmatmul.mubr.msk.f32.gmra.mrb[20].mxu0 %vm486_vm2, %v3173_v28 }
 0x373   : > { %1864 = vmatprep.mubr.msk.f32.mxu0 %vm486_vm2, %v3174_v29 }
 0x376   : > { %1865 = vmatmul.mubr.msk.f32.gmra.mrb[22].mxu0 %vm486_vm2, %v3175_v30 }
 0x377   : > { %1867 = vmatprep.mubr.msk.f32.mxu0 %vm486_vm2, %v3176_v31 }
 0x37a   : > { %1868 = vmatmul.mubr.msk.f32.gmra.mrb[24].mxu0 %vm486_vm2, %v3177_v32 }
 0x37b   : > { %1870 = vmatprep.mubr.msk.f32.mxu0 %vm486_vm2, %v3178_v33 }
 0x37e   : > { %1871 = vmatmul.mubr.msk.f32.gmra.mrb[26].mxu0 %vm486_vm2, %v3179_v34 }
 0x37f   : > { %1873 = vmatprep.mubr.msk.f32.mxu0 %vm486_vm2, %v3180_v2 }
 0x382   : > { %1874 = vmatmul.mubr.msk.f32.gmra.mrb[28].mxu0 %vm486_vm2, %v3181_v57 }
 0x383   : > { %1876 = vmatprep.mubr.msk.f32.mxu0 %vm486_vm2, %v3182_v21 }
 0x386   : > { %1877 = vmatmul.mubr.msk.f32.gmra.mrb[30].mxu0 %vm486_vm2, %v3183_v54 }
 0x387   : > { %1879 = vmatprep.mubr.msk.f32.mxu0 %vm486_vm2, %v3184_v6 }
 0x38a   : > { %1880 = vmatmul.mubr.msk.f32.gmra.mrb[32].mxu0 %vm486_vm2, %v3185_v11 }
 0x41d   : > { %v1711_v51 = vpop.f32.mrb[0].mxu0 }
 0x41e   : > { %v1712_v14 = vpop.f32.mrb[1].mxu0 }
 0x41f   : > { %v1713_v15 = vadd.f32 %v1712_v14, %v1711_v51 }
 0x421   : > { %2061 = vrcp.f32 %v1713_v15  ;;  %v2821_v52 = vpop.f32.mrb[2].mxu0 }
 0x422   : > { %v2823_v16 = vpop.f32.mrb[3].mxu0 }
 0x425   : > { %v2827_v22 = vpop.f32.mrb[4].mxu0 }
 0x426   : > { %v2829_v49 = vpop.f32.mrb[5].mxu0 }
 0x429   : > { %v2832_v62 = vpop.f32.mrb[6].mxu0 }
 0x42a   : > { %v1246_v9 = vmax.f32 %v2821_v52, %v2832_v62  ;;  %v2836_v50 = vpop.f32.mrb[7].mxu0 }
 0x42b   : > { %v2062_v5 = vpop.eup %2061  ;;  %v1245_v41 = vmax.f32 %v2823_v16, %v2836_v50 }
 0x42c   : > { %v1016_v47 = vrot.slane %v2062_v5, %v1015_v18 }
 0x42d   : > { %v2842_v38 = vpop.f32.mrb[8].mxu0 }
 0x42e   : > { %v1017_v36 = vmul.f32 %v1713_v15, %v1016_v47  ;;  %v1248_v48 = vmax.f32 %v2827_v22, %v2842_v38  ;;  %v2846_v37 = vpop.f32.mrb[9].mxu0 }
 0x42f   : > { %v1247_v39 = vmax.f32 %v2829_v49, %v2846_v37 }
 0x430   : > { %v1018_v45 = vadd.f32 %v1017_v36, %v3186_v40 }
 0x431   : > { %v2851_v42 = vpop.f32.mrb[10].mxu0 }
 0x432   : > { %v1250_v55 = vmax.f32 %v1246_v9, %v2851_v42  ;;  %v2854_v56 = vpop.f32.mrb[11].mxu0  ;;  %1019 = vst [vmem:[%s2858_s5] sm:$0xf] %v1018_v45 }
 0x433   : > { %v1249_v46 = vmax.f32 %v1245_v41, %v2854_v56 }
 0x435   : > { %v2862_v58 = vpop.f32.mrb[12].mxu0 }
 0x436   : > { %v1252_v61 = vmax.f32 %v1248_v48, %v2862_v58  ;;  %v2865_v53 = vpop.f32.mrb[13].mxu0 }
 0x437   : > { %v1251_v35 = vmax.f32 %v1247_v39, %v2865_v53 }
 0x439   : > { %v2868_v43 = vpop.f32.mrb[14].mxu0 }
 0x43a   : > { %v1254_v0 = vmax.f32 %v1250_v55, %v2868_v43  ;;  %v2871_v63 = vpop.f32.mrb[15].mxu0 }
 0x43b   : > { %v1253_v60 = vmax.f32 %v1249_v46, %v2871_v63 }
 0x43d   : > { %v2874_v1 = vpop.f32.mrb[16].mxu0 }
 0x43e   : > { %v1256_v4 = vmax.f32 %v1252_v61, %v2874_v1  ;;  %v2877_v3 = vpop.f32.mrb[17].mxu0 }
 0x43f   : > { %v1255_v7 = vmax.f32 %v1251_v35, %v2877_v3 }
 0x441   : > { %v2880_v44 = vpop.f32.mrb[18].mxu0 }
 0x442   : > { %v1258_v8 = vmax.f32 %v1254_v0, %v2880_v44  ;;  %v2883_v12 = vpop.f32.mrb[19].mxu0 }
 0x443   : > { %v1257_v59 = vmax.f32 %v1253_v60, %v2883_v12 }
 0x445   : > { %v2886_v10 = vpop.f32.mrb[20].mxu0 }
 0x446   : > { %v1260_v13 = vmax.f32 %v1256_v4, %v2886_v10  ;;  %v2889_v23 = vpop.f32.mrb[21].mxu0 }
 0x447   : > { %v1259_v24 = vmax.f32 %v1255_v7, %v2889_v23 }
 0x449   : > { %v2892_v25 = vpop.f32.mrb[22].mxu0 }
 0x44a   : > { %v1262_v26 = vmax.f32 %v1258_v8, %v2892_v25  ;;  %v2895_v27 = vpop.f32.mrb[23].mxu0 }
 0x44b   : > { %v1261_v28 = vmax.f32 %v1257_v59, %v2895_v27 }
 0x44d   : > { %v2898_v29 = vpop.f32.mrb[24].mxu0 }
 0x44e   : > { %v1264_v30 = vmax.f32 %v1260_v13, %v2898_v29  ;;  %v2901_v31 = vpop.f32.mrb[25].mxu0 }
 0x44f   : > { %v1263_v32 = vmax.f32 %v1259_v24, %v2901_v31 }
 0x451   : > { %v2904_v33 = vpop.f32.mrb[26].mxu0 }
 0x452   : > { %v1266_v34 = vmax.f32 %v1262_v26, %v2904_v33  ;;  %v2907_v2 = vpop.f32.mrb[27].mxu0 }
 0x453   : > { %v1265_v57 = vmax.f32 %v1261_v28, %v2907_v2 }
 0x455   : > { %v2910_v21 = vpop.f32.mrb[28].mxu0 }
 0x456   : > { %v1268_v54 = vmax.f32 %v1264_v30, %v2910_v21  ;;  %v2913_v6 = vpop.f32.mrb[29].mxu0 }
 0x457   : > { %v1267_v11 = vmax.f32 %v1263_v32, %v2913_v6 }
 0x459   : > { %v2916_v51 = vpop.f32.mrb[30].mxu0 }
 0x45a   : > { %v1270_v14 = vmax.f32 %v1266_v34, %v2916_v51  ;;  %v2919_v15 = vpop.f32.mrb[31].mxu0 }
 0x45b   : > { %v1269_v17 = vmax.f32 %v1265_v57, %v2919_v15 }
 0x45d   : > { %v1273_v9 = vmax.f32 %v1269_v17, %v1270_v14  ;;  %v2922_v5 = vpop.f32.mrb[32].mxu0 }
 0x45e   : > { %v1272_v41 = vmax.f32 %v1268_v54, %v2922_v5  ;;  %v1236_v47 = vpop.f32.mrb[33].mxu0 }
 0x45f   : > { %v1271_v36 = vmax.f32 %v1267_v11, %v1236_v47 }
 0x461   : > { %v1274_v48 = vmax.f32 %v1271_v36, %v1272_v41 }
 0x463   : > { %v1275_v39 = vmax.f32 %v1273_v9, %v1274_v48 }
 0x465   : > { %v1276_v40 = vrot.slane %v1275_v39, 4 }
 0x467   : > { %v1277_v45 = vmax.f32 %v1275_v39, %v1276_v40 }
 0x469   : > { %v1278_v55 = vrot.slane %v1277_v45, 2 }
 0x46b   : > { %v1279_v46 = vmax.f32 %v1277_v45, %v1278_v55 }
 0x46d   : > { %v1280_v61 = vrot.slane %v1279_v46, 1 }
 0x46f   : > { %v2925_v35 = vmax.f32 %v1279_v46, %v1280_v61 }
 0x471   : > { %v1312_v0 = vsub.f32 %v1236_v47, %v2925_v35  ;;  %v1282_v60 = vsub.f32 %v2823_v16, %v2925_v35  ;;  %v1283_v4 = vsub.f32 %v2821_v52, %v2925_v35  ;;  %v1284_v7 = vsub.f32 %v2829_v49, %v2925_v35 }
 0x472   : > { %v1285_v8 = vsub.f32 %v2827_v22, %v2925_v35  ;;  %v1286_v59 = vsub.f32 %v2836_v50, %v2925_v35  ;;  %v1287_v13 = vsub.f32 %v2832_v62, %v2925_v35  ;;  %v1288_v24 = vsub.f32 %v2846_v37, %v2925_v35 }
 0x473   : > { %v1289_v16 = vsub.f32 %v2842_v38, %v2925_v35  ;;  %v1290_v52 = vsub.f32 %v2854_v56, %v2925_v35  ;;  %v1291_v49 = vsub.f32 %v2851_v42, %v2925_v35  ;;  %v1292_v22 = vsub.f32 %v2865_v53, %v2925_v35 }
 0x474   : > { %v1293_v50 = vsub.f32 %v2862_v58, %v2925_v35  ;;  %v1294_v62 = vsub.f32 %v2871_v63, %v2925_v35  ;;  %v1295_v37 = vsub.f32 %v2868_v43, %v2925_v35  ;;  %v1374_v26 = vmul.f32 1.442695, %v1312_v0 }
 0x475   : > { %v1296_v38 = vsub.f32 %v2877_v3, %v2925_v35  ;;  %v1297_v56 = vsub.f32 %v2874_v1, %v2925_v35  ;;  %v1298_v42 = vsub.f32 %v2883_v12, %v2925_v35  ;;  %v1299_v53 = vsub.f32 %v2880_v44, %v2925_v35 }
 0x476   : > { %v1300_v58 = vsub.f32 %v2889_v23, %v2925_v35  ;;  %v1301_v63 = vsub.f32 %v2886_v10, %v2925_v35  ;;  %v1302_v43 = vsub.f32 %v2895_v27, %v2925_v35  ;;  %v1303_v3 = vsub.f32 %v2892_v25, %v2925_v35 }
 0x477   : > { %v1304_v1 = vsub.f32 %v2901_v31, %v2925_v35  ;;  %v1305_v12 = vsub.f32 %v2898_v29, %v2925_v35  ;;  %v1306_v44 = vsub.f32 %v2907_v2, %v2925_v35  ;;  %v1307_v23 = vsub.f32 %v2904_v33, %v2925_v35 }
 0x478   : > { %v1308_v10 = vsub.f32 %v2913_v6, %v2925_v35  ;;  %v1309_v27 = vsub.f32 %v2910_v21, %v2925_v35  ;;  %v1310_v25 = vsub.f32 %v2919_v15, %v2925_v35  ;;  %v1311_v28 = vsub.f32 %v2916_v51, %v2925_v35 }
 0x479   : > { %v1313_v30 = vsub.f32 %v2922_v5, %v2925_v35  ;;  %v1314_v32 = vmul.f32 1.442695, %v1282_v60  ;;  %v1316_v34 = vmul.f32 1.442695, %v1283_v4  ;;  %2063 = vpow2.f32 %v1374_v26 }
 0x47a   : > { %v1318_v57 = vmul.f32 1.442695, %v1284_v7  ;;  %v1320_v54 = vmul.f32 1.442695, %v1285_v8  ;;  %v1322_v11 = vmul.f32 1.442695, %v1286_v59 }
 0x47b   : > { %2065 = vpow2.f32 %v1314_v32  ;;  %v1324_v14 = vmul.f32 1.442695, %v1287_v13  ;;  %v1326_v17 = vmul.f32 1.442695, %v1288_v24  ;;  %v1328_v9 = vmul.f32 1.442695, %v1289_v16 }
 0x47c   : > { %2067 = vpow2.f32 %v1316_v34  ;;  %v1330_v41 = vmul.f32 1.442695, %v1290_v52  ;;  %v1332_v47 = vmul.f32 1.442695, %v1291_v49  ;;  %v1334_v36 = vmul.f32 1.442695, %v1292_v22 }
 0x47d   : > { %2069 = vpow2.f32 %v1318_v57  ;;  %v1336_v48 = vmul.f32 1.442695, %v1293_v50  ;;  %v1338_v39 = vmul.f32 1.442695, %v1294_v62  ;;  %v1340_v45 = vmul.f32 1.442695, %v1295_v37 }
 0x47e   : > { %2071 = vpow2.f32 %v1320_v54  ;;  %v1342_v46 = vmul.f32 1.442695, %v1296_v38  ;;  %v1344_v0 = vmul.f32 1.442695, %v1297_v56  ;;  %v1346_v4 = vmul.f32 1.442695, %v1298_v42 }
 0x47f   : > { %2073 = vpow2.f32 %v1322_v11  ;;  %v1348_v59 = vmul.f32 1.442695, %v1299_v53  ;;  %v1350_v24 = vmul.f32 1.442695, %v1300_v58  ;;  %v1352_v49 = vmul.f32 1.442695, %v1301_v63 }
 0x480   : > { %2075 = vpow2.f32 %v1324_v14  ;;  %v1354_v50 = vmul.f32 1.442695, %v1302_v43  ;;  %v1356_v26 = vmul.f32 1.442695, %v1303_v3  ;;  %v1358_v56 = vmul.f32 1.442695, %v1304_v1 }
 0x481   : > { %2077 = vpow2.f32 %v1326_v17  ;;  %v1360_v58 = vmul.f32 1.442695, %v1305_v12  ;;  %v1362_v43 = vmul.f32 1.442695, %v1306_v44  ;;  %v1364_v1 = vmul.f32 1.442695, %v1307_v23 }
 0x482   : > { %2079 = vpow2.f32 %v1328_v9  ;;  %v1366_v29 = vmul.f32 1.442695, %v1308_v10  ;;  %v1368_v2 = vmul.f32 1.442695, %v1309_v27  ;;  %v1370_v33 = vmul.f32 1.442695, %v1310_v25 }
 0x483   : > { %2081 = vpow2.f32 %v1330_v41  ;;  %v2990_v40 = vpop.eup %2063  ;;  %v1372_v6 = vmul.f32 1.442695, %v1311_v28  ;;  %v1376_v21 = vmul.f32 1.442695, %v1313_v30 }
 0x484   : > { %2083 = vpow2.f32 %v1332_v47 }
 0x485   : > { %v2992_v55 = vpop.eup %2065  ;;  %2085 = vpow2.f32 %v1334_v36 }
 0x486   : > { %v2994_v61 = vpop.eup %2067  ;;  %2087 = vpow2.f32 %v1336_v48 }
 0x487   : > { %v2996_v60 = vpop.eup %2069  ;;  %2089 = vpow2.f32 %v1338_v39  ;;  %v1916_v7 = vpack.c.bf16 %v2994_v61, %v2992_v55 }
 0x488   : > { %v3000_v8 = vpop.eup %2071  ;;  %2091 = vpow2.f32 %v1340_v45 }
 0x489   : > { %v3002_v13 = vpop.eup %2073  ;;  %2093 = vpow2.f32 %v1342_v46  ;;  %v1920_v16 = vpack.c.bf16 %v3000_v8, %v2996_v60 }
 0x48a   : > { %v3006_v52 = vpop.eup %2075  ;;  %2095 = vpow2.f32 %v1344_v0 }
 0x48b   : > { %v3008_v22 = vpop.eup %2077  ;;  %2097 = vpow2.f32 %v1346_v4  ;;  %v1924_v62 = vpack.c.bf16 %v3006_v52, %v3002_v13 }
 0x48c   : > { %v3012_v37 = vpop.eup %2079  ;;  %2099 = vpow2.f32 %v1348_v59  ;;  %v2129_v59 = vld [vmem:[%s2368_s11] sm:$0xff]  ;;  %s2164_s11 = sshll.u32 %s2231_s19, 4  ;;  %s2165_s11 = int_to_ptr.vmem [resolvable:$false] %s2164_s11 }
 0x48d   : > { %v3014_v38 = vpop.eup %2081  ;;  %2101 = vpow2.f32 %v1350_v24  ;;  %v1928_v42 = vpack.c.bf16 %v3012_v37, %v3008_v22  ;;  %v1455_v13 = vrot.slane %v2129_v59, 4  ;;  %s2166_s20 = scalar_lea.vmem %s2165_s11, 256  ;;  %p2167_p10 = scmp.lt.s32.totalorder %s3064_s9, %s2165_s11 }
 0x48e   : > { %v3021_v53 = vpop.eup %2083  ;;  %2103 = vpow2.f32 %v1352_v49  ;;  %p2168_p2 = scmp.lt.s32.totalorder %s2166_s20, %s2160_s14 }
 0x48f   : > { %v2086_v63 = vpop.eup %2085  ;;  %2105 = vpow2.f32 %v1354_v50  ;;  %v1932_v31 = vpack.c.bf16 %v3021_v53, %v3014_v38 }
 0x490   : > { %v2088_v3 = vpop.eup %2087  ;;  %2107 = vpow2.f32 %v1356_v26  ;;  %p2169_p4 = por %p2168_p2, %p2167_p10 }
 0x491   : > { %v2090_v32 = vpop.eup %2089  ;;  %2109 = vpow2.f32 %v1358_v56  ;;  %v1936_v12 = vpack.c.bf16 %v2088_v3, %v2086_v63 }
 0x492   : > { %v2092_v34 = vpop.eup %2091  ;;  %2111 = vpow2.f32 %v1360_v58  ;;  %p2170_p5 = pnand %p2169_p4, %p2163_p7 }
 0x493   : > { %v2094_v44 = vpop.eup %2093  ;;  %2113 = vpow2.f32 %v1362_v43  ;;  %v1940_v23 = vpack.c.bf16 %v2092_v34, %v2090_v32 }
 0x494   : > { %v2096_v57 = vpop.eup %2095  ;;  %2115 = vpow2.f32 %v1364_v1 }
 0x495   : > { %v2098_v10 = vpop.eup %2097  ;;  %2117 = vpow2.f32 %v1366_v29  ;;  %v1944_v27 = vpack.c.bf16 %v2096_v57, %v2094_v44 }
 0x496   : > { %v2100_v54 = vpop.eup %2099  ;;  %2119 = vpow2.f32 %v1368_v2 }
 0x497   : > { %v2102_v11 = vpop.eup %2101  ;;  %2121 = vpow2.f32 %v1370_v33  ;;  %v1914_v15 = vpack.c.bf16 %v2100_v54, %v2098_v10 }
 0x498   : > { %v2104_v25 = vpop.eup %2103  ;;  %2123 = vpow2.f32 %v1372_v6 }
 0x499   : > { %v2106_v14 = vpop.eup %2105  ;;  %2125 = vpow2.f32 %v1376_v21  ;;  %1915 = vmatprep.subr.bf16.mxu1 %v1914_v15  ;;  %v1918_v17 = vpack.c.bf16 %v2104_v25, %v2102_v11 }
 0x49a   : > { %v2108_v51 = vpop.eup %2107  ;;  %1917 = vmatpush3.bf16.msra.mxu1 %v1916_v7 }
 0x49b   : > { %v2110_v28 = vpop.eup %2109  ;;  %1919 = vmatprep.subr.bf16.mxu1 %v1918_v17  ;;  %v1922_v9 = vpack.c.bf16 %v2108_v51, %v2106_v14 }
 0x49c   : > { %v2112_v41 = vpop.eup %2111 }
 0x49d   : > { %v2114_v5 = vpop.eup %2113  ;;  %v1926_v35 = vpack.c.bf16 %v2112_v41, %v2110_v28 }
 0x49e   : > { %v2116_v30 = vpop.eup %2115  ;;  %1921 = vmatpush3.bf16.msra.mxu1 %v1920_v16 }
 0x49f   : > { %v2118_v47 = vpop.eup %2117  ;;  %1923 = vmatprep.subr.bf16.mxu1 %v1922_v9  ;;  %v1930_v36 = vpack.c.bf16 %v2116_v30, %v2114_v5 }
 0x4a0   : > { %v2120_v48 = vpop.eup %2119 }
 0x4a1   : > { %v2122_v39 = vpop.eup %2121  ;;  %v1934_v45 = vpack.c.bf16 %v2120_v48, %v2118_v47 }
 0x4a2   : > { %v2124_v55 = vpop.eup %2123  ;;  %1925 = vmatpush3.bf16.msra.mxu1 %v1924_v62 }
 0x4a3   : > { %v2126_v46 = vpop.eup %2125  ;;  %1927 = vmatprep.subr.bf16.mxu1 %v1926_v35  ;;  %v1938_v61 = vpack.c.bf16 %v2124_v55, %v2122_v39 }
 0x4a4   : > { %v1942_v0 = vpack.c.bf16 %v2126_v46, %v2990_v40 }
 0x4a6   : > { %1929 = vmatpush3.bf16.msra.mxu1 %v1928_v42 }
 0x4a7   : > { %1931 = vmatprep.subr.bf16.mxu1 %v1930_v36 }
 0x4aa   : > { %1933 = vmatpush3.bf16.msra.mxu1 %v1932_v31 }
 0x4ab   : > { %1935 = vmatprep.subr.bf16.mxu1 %v1934_v45 }
 0x4ae   : > { %1937 = vmatpush3.bf16.msra.mxu1 %v1936_v12 }
 0x4af   : > { %1939 = vmatprep.subr.bf16.mxu1 %v1938_v61 }
 0x4b2   : > { %1941 = vmatpush3.bf16.msra.mxu1 %v1940_v23 }
 0x4b3   : > { %1943 = vmatprep.subr.bf16.mxu1 %v1942_v0 }
 0x4b6   : > { %1945 = vmatpush3.bf16.msra.mxu1 %v1944_v27 }
 0x4b9   : > { %1443 = vmatmul.mubr.f32.vlgmr.msra.gmra.mrb[38].mxu1 %v2399_v19 }
 0x58c   : > { %v1779_v60 = vpop.f32.mrb[38].mxu1 }
 0x58d   : > { %v1780_v4 = vpop.f32.mrb[39].mxu1 }
 0x58e   : > { %v1781_v7 = vadd.f32 %v1780_v4, %v1779_v60 }
 0x590   : > { %2127 = vrcp.f32 %v1781_v7 }
 0x59a   : > { %v2128_v40 = vpop.eup %2127 }
 0x59b   : > { %v1453_v8 = vrot.slane %v2128_v40, %v1015_v18 }
 0x59d   : > { %v1454_v24 = vmul.f32 %v1781_v7, %v1453_v8 }
 0x59f   : > { %v1457_v16 = vadd.f32 %v1455_v13, %v1454_v24 }
 0x5a1   : > { %1458 = vst [vmem:[%s2858_s5 + $0x4] sm:$0xf] %v1457_v16 }
 0x5a2   : > { %2173 = shalt.err (!%p2170_p5)
}
 0x5a3   : > { %s2174_s7 = scalar_lea.hbm %s3062_s10, 128  ;;  %s2178_s26 = scalar_lea.hbm %s3111_s4, 256 }
 0x5a4   : > { %p2175_p8 = scmp.ne.s32.totalorder %s3062_s10, %s2174_s7  ;;  %p2179_p1 = scmp.lt.u32.totalorder %s3062_s10, %s3111_s4 }
 0x5a5   : > { %p2180_p3 = scmp.lt.u32.totalorder %s2178_s26, %s2174_s7  ;;  %p2182_p6 = scmp.lt.u32.totalorder %s2174_s7, %s3062_s10 }
 0x5a6   : > { %p2176_p9 = pnand %p2175_p8, %p3187_p12 }
 0x5a7   : > { %p2181_p11 = por %p2180_p3, %p2179_p1 }
 0x5a8   : > { %p2177_p0 = pneg %p2176_p9 }
 0x5a9   : > { %p2183_p13 = por %p2182_p6, %p2181_p11 }
 0x5ab   : > { %p2184_p7 = pnand %p2183_p13, %p2177_p0 }
 0x5ad   : > { %2187 = shalt.err (!%p2184_p7)
}
 0x5ae   : > { %1948 = dma.vmem_to_hbm [thread:$0]  (%p3187_p12), %s3064_s9, 128, %s3062_s10, %s1460_s12  }
 0x5af PF: > { %s1486_s30 = sand.u32 1, %s2214_s15   ;;  %p3188_p10 = scmp.ne.s32.totalorder %s3137_s28, 0 }
 0x5b0   : > { %p3189_p2 = scmp.ge.s32.totalorder %s2226_s18, 2  ;;  %s1487_s5 = scalar_lea.sflag [#allocation4], %s1486_s30 }
 0x5b2   : > { %p1955_p4 = pnand %p3189_p2, %p3188_p10 }
 0x5b4   : > { %2209 = dma.done.wait (!%p1955_p4), %s1487_s5, 128  }
 0x5b5   : > { %2211 = vsyncadd (!%p1955_p4), %s1487_s5, 4294967168  ;;  %p17_p5 = scmp.ge.s32.totalorder %s2282_s21, 4   ;;  %s3190_s15 = smov %s2218_s16 }
 0x5b6   : > { %s3191_s16 = smov %s2222_s17  ;;  %s3192_s17 = smov %s2294_s24 }
 0x5b7   : > { %s3193_s18 = smov %s2282_s21  ;;  %19 = sbr.rel (!%p17_p5) target bundleno = 5 (0x5), region = 84 }
 0x5be   :  { %1492 = vsyncpa [#allocation3], 1 }
 0x5bf   :  { %1494 = vsyncpa [#allocation3 + $0x1], 1 }
 0x5c0   :  { %1495 = vsyncpa [#allocation4], 1 }
 0x5c1   :  { %1497 = vsyncpa [#allocation4 + $0x1], 1 }

</bundles_post_ra>
